<compile_context>
chip_gen: v7x
topology: tpu7x:2x2x1
jax: 0.10.0
libtpu: 0.0.40
codegen_flags: <defaults>
</compile_context>

<pallas_src>
import functools

import jax
import jax.numpy as jnp
from jax.experimental import pallas as pl
from jax.experimental.pallas import tpu as pltpu

_LANES = 128


def _round_up(n, m=_LANES):
    return ((n + m - 1) // m) * m


def _encoder_layer_kernel(
    x_ref,        # (B, S, Dp)
    wqkv_ref,     # (Dp, 2*Ap + Dp)   fused [Wq | Wk | Wv], pre-transposed & padded
    wmha_ref,     # (Dp, Dp)          MHA output Linear, pre-transposed & padded
    w2_ref,       # (Dp, Dp)          fc2 weight, pre-transposed & padded
    b2_ref,       # (1, Dp)
    w1_ref,       # (Dp, Dp)          fc1 weight, pre-transposed & padded
    b1_ref,       # (1, Dp)
    g1_ref,       # (1, Dp)           norm1 gamma (zero in padded lanes)
    be1_ref,      # (1, Dp)           norm1 beta
    g2_ref,       # (1, Dp)           norm2 gamma
    be2_ref,      # (1, Dp)           norm2 beta
    o_ref,        # (B, S, Dp)
    *,
    dim_val,
    dim_attn,
    attn_pad,
):
    B, S, DP = x_ref.shape
    AP = attn_pad

    x3 = x_ref[...]                       # (B, S, Dp), padded lanes are 0
    x2 = x3.reshape(B * S, DP)            # flatten batch*seq for the linears

    # ---- fused Q/K/V projection (one MXU pass) ---------------------------
    qkv = jnp.dot(x2, wqkv_ref[...], preferred_element_type=jnp.float32)
    q = qkv[:, :AP].reshape(B, S, AP)
    k = qkv[:, AP:2 * AP].reshape(B, S, AP)
    v = qkv[:, 2 * AP:].reshape(B, S, DP)

    # ---- single-head self-attention (batched, no explicit transpose) -----
    scale = jnp.float32(1.0 / (float(dim_attn) ** 0.5))
    scores = jnp.einsum(
        "bqa,bka->bqk", q, k, preferred_element_type=jnp.float32) * scale
    m = jnp.max(scores, axis=-1, keepdims=True)
    e = jnp.exp(scores - m)
    p = e * pl.reciprocal(jnp.sum(e, axis=-1, keepdims=True), approx=True)
    attn = jnp.einsum("bqk,bkd->bqd", p, v, preferred_element_type=jnp.float32)
    a = jnp.dot(attn.reshape(B * S, DP), wmha_ref[...],
                preferred_element_type=jnp.float32)          # (B*S, Dp)

    # ---- masked LayerNorm over the real dim_val lanes ---------------------
    lane = jax.lax.broadcasted_iota(jnp.int32, (1, DP), 1)
    mask = (lane < dim_val).astype(jnp.float32)               # (1, Dp)
    inv_d = jnp.float32(1.0 / float(dim_val))

    def layernorm(h, g, b):
        # padded lanes of h are exactly 0, so sum/ dim_val is the true mean.
        mu = jnp.sum(h, axis=-1, keepdims=True) * inv_d
        d = (h - mu) * mask
        var = jnp.sum(d * d, axis=-1, keepdims=True) * inv_d
        return d * jax.lax.rsqrt(var + 1e-5) * g + b          # padded lanes -> 0

    h = layernorm(x2 + a, g1_ref[...], be1_ref[...])

    # ---- feed-forward: fc1(ELU(fc2(h))) -----------------------------------
    z = jnp.dot(h, w2_ref[...], preferred_element_type=jnp.float32) + b2_ref[...]
    z = jnp.where(z > 0, z, jnp.exp(jnp.minimum(z, 0.0)) - 1.0)   # ELU, alpha=1
    z = jnp.dot(z, w1_ref[...], preferred_element_type=jnp.float32) + b1_ref[...]

    y = layernorm(h + z, g2_ref[...], be2_ref[...])

    o_ref[...] = y.reshape(B, S, DP)


def _pad2d(w, rows, cols):
    return jnp.pad(w, ((0, rows - w.shape[0]), (0, cols - w.shape[1])))


def sensors_encoder_layer(x, params, *, dim_attn):
    """x: (B, S, dim_val) float32. params: dict of pre-transposed weights."""
    B, S, D = x.shape
    A = params["wq_t"].shape[1]
    assert A == dim_attn

    DP = _round_up(D)
    AP = _round_up(A)

    # ---- zero-pad everything to lane-dense (multiple-of-128) shapes -------
    x_p = jnp.pad(x, ((0, 0), (0, 0), (0, DP - D)))
    wqkv = jnp.concatenate(
        [_pad2d(params["wq_t"], DP, AP),
         _pad2d(params["wk_t"], DP, AP),
         _pad2d(params["wv_t"], DP, DP)], axis=1)              # (DP, 2*AP+DP)
    wmha = _pad2d(params["wmha_t"], DP, DP)
    w2 = _pad2d(params["w2_t"], DP, DP)
    w1 = _pad2d(params["w1_t"], DP, DP)
    pad1 = lambda v: jnp.pad(v, ((0, 0), (0, DP - D)))
    b2, b1 = pad1(params["b2"]), pad1(params["b1"])
    g1, be1 = pad1(params["gamma1"]), pad1(params["beta1"])
    g2, be2 = pad1(params["gamma2"]), pad1(params["beta2"])

    full = lambda shape: pl.BlockSpec(shape, lambda i: (0,) * len(shape))

    kernel = functools.partial(
        _encoder_layer_kernel, dim_val=D, dim_attn=dim_attn, attn_pad=AP)

    out = pl.pallas_call(
        kernel,
        out_shape=jax.ShapeDtypeStruct((B, S, DP), jnp.float32),
        grid_spec=pltpu.PrefetchScalarGridSpec(
            num_scalar_prefetch=0,
            grid=(1,),                       # single step: whole problem fits VMEM
            in_specs=[
                full((B, S, DP)),            # x (padded)
                full((DP, 2 * AP + DP)),     # fused Wqkv
                full((DP, DP)),              # Wmha
                full((DP, DP)),              # W2
                full((1, DP)),               # b2
                full((DP, DP)),              # W1
                full((1, DP)),               # b1
                full((1, DP)),               # gamma1
                full((1, DP)),               # beta1
                full((1, DP)),               # gamma2
                full((1, DP)),               # beta2
            ],
            out_specs=full((B, S, DP)),
        ),
        compiler_params=pltpu.CompilerParams(
            dimension_semantics=("arbitrary",)),
    )(x_p, wqkv, wmha, w2, b2, w1, b1, g1, be1, g2, be2)

    return out[:, :, :D]


def _reference(x, p, dim_attn):
    """Pure-JAX reference mirroring the PyTorch forward."""
    q = x @ p["wq_t"]
    k = x @ p["wk_t"]
    v = x @ p["wv_t"]
    scores = jnp.einsum("bqa,bka->bqk", q, k) / jnp.sqrt(jnp.float32(dim_attn))
    pr = jax.nn.softmax(scores, axis=-1)
    a = jnp.einsum("bqk,bkd->bqd", pr, v) @ p["wmha_t"]

    def layernorm(h, g, b):
        mu = jnp.mean(h, axis=-1, keepdims=True)
        var = jnp.mean((h - mu) ** 2, axis=-1, keepdims=True)
        return (h - mu) / jnp.sqrt(var + 1e-5) * g + b

    h = layernorm(x + a, p["gamma1"], p["beta1"])
    z = h @ p["w2_t"] + p["b2"]
    z = jnp.where(z > 0, z, jnp.exp(jnp.minimum(z, 0.0)) - 1.0)
    z = z @ p["w1_t"] + p["b1"]
    return layernorm(h + z, p["gamma2"], p["beta2"])


def _make_params(key, dim_val, dim_attn):
    ks = jax.random.split(key, 8)
    scale = 0.1
    return {
        # attention projections (nn.Linear(dim_val, dim_*), bias=False), stored transposed
        "wq_t":   scale * jax.random.normal(ks[0], (dim_val, dim_attn), jnp.float32),
        "wk_t":   scale * jax.random.normal(ks[1], (dim_val, dim_attn), jnp.float32),
        "wv_t":   scale * jax.random.normal(ks[2], (dim_val, dim_val), jnp.float32),
        # multi-head output Linear(n_heads*dim_val, dim_val, bias=False), n_heads=1
        "wmha_t": scale * jax.random.normal(ks[3], (dim_val, dim_val), jnp.float32),
        # fc2 / fc1 (with bias)
        "w2_t":   scale * jax.random.normal(ks[4], (dim_val, dim_val), jnp.float32),
        "b2":     scale * jax.random.normal(ks[5], (1, dim_val), jnp.float32),
        "w1_t":   scale * jax.random.normal(ks[6], (dim_val, dim_val), jnp.float32),
        "b1":     scale * jax.random.normal(ks[7], (1, dim_val), jnp.float32),
        # LayerNorm affine params (torch init: gamma=1, beta=0)
        "gamma1": jnp.ones((1, dim_val), jnp.float32),
        "beta1":  jnp.zeros((1, dim_val), jnp.float32),
        "gamma2": jnp.ones((1, dim_val), jnp.float32),
        "beta2":  jnp.zeros((1, dim_val), jnp.float32),
    }


if __name__ == "__main__":
    B, S = 2, 8              # batch, number of sensors (sequence length)
    dim_val, dim_attn = 32, 32

    key = jax.random.PRNGKey(0)
    kx, kp = jax.random.split(key)
    x = jax.random.normal(kx, (B, S, dim_val), jnp.float32)
    params = _make_params(kp, dim_val, dim_attn)

    out = sensors_encoder_layer(x, params, dim_attn=dim_attn)
    out = jax.block_until_ready(out)

    ref = _reference(x, params, dim_attn)
    assert out.shape == (B, S, dim_val)
    # Tolerance accounts for the EUP approximate reciprocal in the softmax.
    assert jnp.allclose(out, ref, atol=5e-3, rtol=5e-3), float(
        jnp.max(jnp.abs(out - ref)))

    print("KERNEL_OK")
</pallas_src>

<mosaic_0001>
module attributes {stable_mosaic.version = 11 : i64} {
  func.func @_encoder_layer_kernel(%arg0: i32, %arg1: memref<2x8x128xf32, #tpu.memory_space<vmem>>, %arg2: memref<128x384xf32, #tpu.memory_space<vmem>>, %arg3: memref<128x128xf32, #tpu.memory_space<vmem>>, %arg4: memref<128x128xf32, #tpu.memory_space<vmem>>, %arg5: memref<1x128xf32, #tpu.memory_space<vmem>>, %arg6: memref<128x128xf32, #tpu.memory_space<vmem>>, %arg7: memref<1x128xf32, #tpu.memory_space<vmem>>, %arg8: memref<1x128xf32, #tpu.memory_space<vmem>>, %arg9: memref<1x128xf32, #tpu.memory_space<vmem>>, %arg10: memref<1x128xf32, #tpu.memory_space<vmem>>, %arg11: memref<1x128xf32, #tpu.memory_space<vmem>>, %arg12: memref<2x8x128xf32, #tpu.memory_space<vmem>>) attributes {dimension_semantics = [#tpu.dimension_semantics<arbitrary>], iteration_bounds = array<i64: 1>, scalar_prefetch = 0 : i64, scratch_operands = 0 : i64, tpu.core_type = #tpu.core_type<tc>, window_params = [{pipeline_mode = #tpu.pipeline_mode<synchronous>, transform_indices = @transform_0, window_bounds = array<i64: 2, 8, 128>}, {pipeline_mode = #tpu.pipeline_mode<synchronous>, transform_indices = @transform_1, window_bounds = array<i64: 128, 384>}, {pipeline_mode = #tpu.pipeline_mode<synchronous>, transform_indices = @transform_2, window_bounds = array<i64: 128, 128>}, {pipeline_mode = #tpu.pipeline_mode<synchronous>, transform_indices = @transform_3, window_bounds = array<i64: 128, 128>}, {pipeline_mode = #tpu.pipeline_mode<synchronous>, transform_indices = @transform_4, window_bounds = array<i64: 1, 128>}, {pipeline_mode = #tpu.pipeline_mode<synchronous>, transform_indices = @transform_5, window_bounds = array<i64: 128, 128>}, {pipeline_mode = #tpu.pipeline_mode<synchronous>, transform_indices = @transform_6, window_bounds = array<i64: 1, 128>}, {pipeline_mode = #tpu.pipeline_mode<synchronous>, transform_indices = @transform_7, window_bounds = array<i64: 1, 128>}, {pipeline_mode = #tpu.pipeline_mode<synchronous>, transform_indices = @transform_8, window_bounds = array<i64: 1, 128>}, {pipeline_mode = #tpu.pipeline_mode<synchronous>, transform_indices = @transform_9, window_bounds = array<i64: 1, 128>}, {pipeline_mode = #tpu.pipeline_mode<synchronous>, transform_indices = @transform_10, window_bounds = array<i64: 1, 128>}, {pipeline_mode = #tpu.pipeline_mode<synchronous>, transform_indices = @transform_11, window_bounds = array<i64: 2, 8, 128>}]} {
    %c0 = arith.constant 0 : index
    %c0_0 = arith.constant 0 : index
    %c0_1 = arith.constant 0 : index
    %0 = vector.load %arg1[%c0, %c0_0, %c0_1] : memref<2x8x128xf32, #tpu.memory_space<vmem>>, vector<2x8x128xf32>
    %1 = vector.shape_cast %0 : vector<2x8x128xf32> to vector<16x128xf32>
    %c0_2 = arith.constant 0 : index
    %c0_3 = arith.constant 0 : index
    %2 = vector.load %arg2[%c0_2, %c0_3] : memref<128x384xf32, #tpu.memory_space<vmem>>, vector<128x384xf32>
    %cst = arith.constant dense<0.000000e+00> : vector<16x384xf32>
    %3 = tpu.matmul %1, %2, %cst {dimension_numbers = #tpu.dot_dimension_numbers<[1], [0], [0], [1], [0, 0, 1, 1], [], []>} : vector<16x128xf32>, vector<128x384xf32>, vector<16x384xf32> -> vector<16x384xf32>
    %4 = vector.extract_strided_slice %3 {offsets = [0, 0], sizes = [16, 128], strides = [1, 1]} : vector<16x384xf32> to vector<16x128xf32>
    %5 = vector.shape_cast %4 : vector<16x128xf32> to vector<2x8x128xf32>
    %6 = vector.extract_strided_slice %3 {offsets = [0, 128], sizes = [16, 128], strides = [1, 1]} : vector<16x384xf32> to vector<16x128xf32>
    %7 = vector.shape_cast %6 : vector<16x128xf32> to vector<2x8x128xf32>
    %8 = vector.extract_strided_slice %3 {offsets = [0, 256], sizes = [16, 128], strides = [1, 1]} : vector<16x384xf32> to vector<16x128xf32>
    %9 = vector.shape_cast %8 : vector<16x128xf32> to vector<2x8x128xf32>
    "tpu.trace_start"() <{level = 10 : i32, message = "bqa,bka->bqk"}> : () -> ()
    %cst_4 = arith.constant dense<0.000000e+00> : vector<2x8x8xf32>
    %10 = tpu.matmul %5, %7, %cst_4 {dimension_numbers = #tpu.dot_dimension_numbers<[2], [2], [1], [1], [0, 0, 0, 1, 1, 1], [0], [0]>} : vector<2x8x128xf32>, vector<2x8x128xf32>, vector<2x8x8xf32> -> vector<2x8x8xf32>
    "tpu.trace_stop"() : () -> ()
    %cst_5 = arith.constant 0.176776692 : f32
    %11 = vector.broadcast %cst_5 : f32 to vector<2x8x8xf32>
    %12 = arith.mulf %10, %11 : vector<2x8x8xf32>
    %cst_6 = arith.constant dense<0xFF800000> : vector<2x8xf32>
    %13 = vector.multi_reduction <maximumf>, %12, %cst_6 [2] : vector<2x8x8xf32> to vector<2x8xf32>
    %14 = vector.shape_cast %13 : vector<2x8xf32> to vector<2x8x1xf32>
    %15 = vector.broadcast %14 : vector<2x8x1xf32> to vector<2x8x8xf32>
    %16 = arith.subf %12, %15 : vector<2x8x8xf32>
    %17 = math.exp %16 : vector<2x8x8xf32>
    %cst_7 = arith.constant dense<0.000000e+00> : vector<2x8xf32>
    %18 = vector.multi_reduction <add>, %17, %cst_7 [2] : vector<2x8x8xf32> to vector<2x8xf32>
    %19 = vector.shape_cast %18 : vector<2x8xf32> to vector<2x8x1xf32>
    %20 = tpu.reciprocal %19 {approx = true} : vector<2x8x1xf32> -> vector<2x8x1xf32>
    %21 = vector.broadcast %20 : vector<2x8x1xf32> to vector<2x8x8xf32>
    %22 = arith.mulf %17, %21 : vector<2x8x8xf32>
    "tpu.trace_start"() <{level = 10 : i32, message = "bqk,bkd->bqd"}> : () -> ()
    %cst_8 = arith.constant dense<0.000000e+00> : vector<2x8x128xf32>
    %23 = tpu.matmul %22, %9, %cst_8 {dimension_numbers = #tpu.dot_dimension_numbers<[2], [1], [1], [2], [0, 0, 0, 1, 1, 2], [0], [0]>} : vector<2x8x8xf32>, vector<2x8x128xf32>, vector<2x8x128xf32> -> vector<2x8x128xf32>
    "tpu.trace_stop"() : () -> ()
    %24 = vector.shape_cast %23 : vector<2x8x128xf32> to vector<16x128xf32>
    %c0_9 = arith.constant 0 : index
    %c0_10 = arith.constant 0 : index
    %25 = vector.load %arg3[%c0_9, %c0_10] : memref<128x128xf32, #tpu.memory_space<vmem>>, vector<128x128xf32>
    %cst_11 = arith.constant dense<0.000000e+00> : vector<16x128xf32>
    %26 = tpu.matmul %24, %25, %cst_11 {dimension_numbers = #tpu.dot_dimension_numbers<[1], [0], [0], [1], [0, 0, 1, 1], [], []>} : vector<16x128xf32>, vector<128x128xf32>, vector<16x128xf32> -> vector<16x128xf32>
    %27 = tpu.iota {dimensions = array<i32: 1>} : vector<1x128xi32>
    %c32_i32 = arith.constant 32 : i32
    %28 = vector.broadcast %c32_i32 : i32 to vector<1x128xi32>
    %29 = arith.cmpi slt, %27, %28 : vector<1x128xi32>
    %30 = arith.extui %29 : vector<1x128xi1> to vector<1x128xi32>
    %31 = arith.sitofp %30 : vector<1x128xi32> to vector<1x128xf32>
    %32 = arith.addf %1, %26 : vector<16x128xf32>
    %c0_12 = arith.constant 0 : index
    %c0_13 = arith.constant 0 : index
    %33 = vector.load %arg8[%c0_12, %c0_13] : memref<1x128xf32, #tpu.memory_space<vmem>>, vector<1x128xf32>
    %c0_14 = arith.constant 0 : index
    %c0_15 = arith.constant 0 : index
    %34 = vector.load %arg9[%c0_14, %c0_15] : memref<1x128xf32, #tpu.memory_space<vmem>>, vector<1x128xf32>
    %cst_16 = arith.constant dense<0.000000e+00> : vector<16xf32>
    %35 = vector.multi_reduction <add>, %32, %cst_16 [1] : vector<16x128xf32> to vector<16xf32>
    %36 = vector.shape_cast %35 : vector<16xf32> to vector<16x1xf32>
    %cst_17 = arith.constant 3.125000e-02 : f32
    %37 = vector.broadcast %cst_17 : f32 to vector<16x1xf32>
    %38 = arith.mulf %36, %37 : vector<16x1xf32>
    %39 = vector.broadcast %38 : vector<16x1xf32> to vector<16x128xf32>
    %40 = arith.subf %32, %39 : vector<16x128xf32>
    %41 = vector.broadcast %31 : vector<1x128xf32> to vector<16x128xf32>
    %42 = arith.mulf %40, %41 : vector<16x128xf32>
    %43 = arith.mulf %42, %42 : vector<16x128xf32>
    %cst_18 = arith.constant dense<0.000000e+00> : vector<16xf32>
    %44 = vector.multi_reduction <add>, %43, %cst_18 [1] : vector<16x128xf32> to vector<16xf32>
    %45 = vector.shape_cast %44 : vector<16xf32> to vector<16x1xf32>
    %cst_19 = arith.constant 3.125000e-02 : f32
    %46 = vector.broadcast %cst_19 : f32 to vector<16x1xf32>
    %47 = arith.mulf %45, %46 : vector<16x1xf32>
    %cst_20 = arith.constant 9.99999974E-6 : f32
    %48 = vector.broadcast %cst_20 : f32 to vector<16x1xf32>
    %49 = arith.addf %47, %48 : vector<16x1xf32>
    %50 = math.rsqrt %49 : vector<16x1xf32>
    %51 = vector.broadcast %50 : vector<16x1xf32> to vector<16x128xf32>
    %52 = arith.mulf %42, %51 : vector<16x128xf32>
    %53 = vector.broadcast %33 : vector<1x128xf32> to vector<16x128xf32>
    %54 = arith.mulf %52, %53 : vector<16x128xf32>
    %55 = vector.broadcast %34 : vector<1x128xf32> to vector<16x128xf32>
    %56 = arith.addf %54, %55 : vector<16x128xf32>
    %c0_21 = arith.constant 0 : index
    %c0_22 = arith.constant 0 : index
    %57 = vector.load %arg4[%c0_21, %c0_22] : memref<128x128xf32, #tpu.memory_space<vmem>>, vector<128x128xf32>
    %cst_23 = arith.constant dense<0.000000e+00> : vector<16x128xf32>
    %58 = tpu.matmul %56, %57, %cst_23 {dimension_numbers = #tpu.dot_dimension_numbers<[1], [0], [0], [1], [0, 0, 1, 1], [], []>} : vector<16x128xf32>, vector<128x128xf32>, vector<16x128xf32> -> vector<16x128xf32>
    %c0_24 = arith.constant 0 : index
    %c0_25 = arith.constant 0 : index
    %59 = vector.load %arg5[%c0_24, %c0_25] : memref<1x128xf32, #tpu.memory_space<vmem>>, vector<1x128xf32>
    %60 = vector.broadcast %59 : vector<1x128xf32> to vector<16x128xf32>
    %61 = arith.addf %58, %60 : vector<16x128xf32>
    %cst_26 = arith.constant 0.000000e+00 : f32
    %62 = vector.broadcast %cst_26 : f32 to vector<16x128xf32>
    %63 = arith.cmpf ogt, %61, %62 : vector<16x128xf32>
    %cst_27 = arith.constant 0.000000e+00 : f32
    %64 = vector.broadcast %cst_27 : f32 to vector<16x128xf32>
    %65 = arith.minimumf %61, %64 : vector<16x128xf32>
    %66 = math.exp %65 : vector<16x128xf32>
    %cst_28 = arith.constant 1.000000e+00 : f32
    %67 = vector.broadcast %cst_28 : f32 to vector<16x128xf32>
    %68 = arith.subf %66, %67 : vector<16x128xf32>
    %69 = arith.select %63, %61, %68 : vector<16x128xi1>, vector<16x128xf32>
    %c0_29 = arith.constant 0 : index
    %c0_30 = arith.constant 0 : index
    %70 = vector.load %arg6[%c0_29, %c0_30] : memref<128x128xf32, #tpu.memory_space<vmem>>, vector<128x128xf32>
    %cst_31 = arith.constant dense<0.000000e+00> : vector<16x128xf32>
    %71 = tpu.matmul %69, %70, %cst_31 {dimension_numbers = #tpu.dot_dimension_numbers<[1], [0], [0], [1], [0, 0, 1, 1], [], []>} : vector<16x128xf32>, vector<128x128xf32>, vector<16x128xf32> -> vector<16x128xf32>
    %c0_32 = arith.constant 0 : index
    %c0_33 = arith.constant 0 : index
    %72 = vector.load %arg7[%c0_32, %c0_33] : memref<1x128xf32, #tpu.memory_space<vmem>>, vector<1x128xf32>
    %73 = vector.broadcast %72 : vector<1x128xf32> to vector<16x128xf32>
    %74 = arith.addf %71, %73 : vector<16x128xf32>
    %75 = arith.addf %56, %74 : vector<16x128xf32>
    %c0_34 = arith.constant 0 : index
    %c0_35 = arith.constant 0 : index
    %76 = vector.load %arg10[%c0_34, %c0_35] : memref<1x128xf32, #tpu.memory_space<vmem>>, vector<1x128xf32>
    %c0_36 = arith.constant 0 : index
    %c0_37 = arith.constant 0 : index
    %77 = vector.load %arg11[%c0_36, %c0_37] : memref<1x128xf32, #tpu.memory_space<vmem>>, vector<1x128xf32>
    %cst_38 = arith.constant dense<0.000000e+00> : vector<16xf32>
    %78 = vector.multi_reduction <add>, %75, %cst_38 [1] : vector<16x128xf32> to vector<16xf32>
    %79 = vector.shape_cast %78 : vector<16xf32> to vector<16x1xf32>
    %cst_39 = arith.constant 3.125000e-02 : f32
    %80 = vector.broadcast %cst_39 : f32 to vector<16x1xf32>
    %81 = arith.mulf %79, %80 : vector<16x1xf32>
    %82 = vector.broadcast %81 : vector<16x1xf32> to vector<16x128xf32>
    %83 = arith.subf %75, %82 : vector<16x128xf32>
    %84 = vector.broadcast %31 : vector<1x128xf32> to vector<16x128xf32>
    %85 = arith.mulf %83, %84 : vector<16x128xf32>
    %86 = arith.mulf %85, %85 : vector<16x128xf32>
    %cst_40 = arith.constant dense<0.000000e+00> : vector<16xf32>
    %87 = vector.multi_reduction <add>, %86, %cst_40 [1] : vector<16x128xf32> to vector<16xf32>
    %88 = vector.shape_cast %87 : vector<16xf32> to vector<16x1xf32>
    %cst_41 = arith.constant 3.125000e-02 : f32
    %89 = vector.broadcast %cst_41 : f32 to vector<16x1xf32>
    %90 = arith.mulf %88, %89 : vector<16x1xf32>
    %cst_42 = arith.constant 9.99999974E-6 : f32
    %91 = vector.broadcast %cst_42 : f32 to vector<16x1xf32>
    %92 = arith.addf %90, %91 : vector<16x1xf32>
    %93 = math.rsqrt %92 : vector<16x1xf32>
    %94 = vector.broadcast %93 : vector<16x1xf32> to vector<16x128xf32>
    %95 = arith.mulf %85, %94 : vector<16x128xf32>
    %96 = vector.broadcast %76 : vector<1x128xf32> to vector<16x128xf32>
    %97 = arith.mulf %95, %96 : vector<16x128xf32>
    %98 = vector.broadcast %77 : vector<1x128xf32> to vector<16x128xf32>
    %99 = arith.addf %97, %98 : vector<16x128xf32>
    %100 = vector.shape_cast %99 : vector<16x128xf32> to vector<2x8x128xf32>
    %c0_43 = arith.constant 0 : index
    %c0_44 = arith.constant 0 : index
    %c0_45 = arith.constant 0 : index
    %101 = vector.load %arg12[%c0_43, %c0_44, %c0_45] : memref<2x8x128xf32, #tpu.memory_space<vmem>>, vector<2x8x128xf32>
    tpu.vector_store %arg12[%c0_43, %c0_44, %c0_45], %100 {strides = array<i32>} : memref<2x8x128xf32, #tpu.memory_space<vmem>>, vector<2x8x128xf32>,
    return
  }
  func.func @transform_0(%arg0: i32) -> (i32, i32, i32) {
    %c0_i32 = arith.constant 0 : i32
    %c0_i32_0 = arith.constant 0 : i32
    %c0_i32_1 = arith.constant 0 : i32
    %c0_i32_2 = arith.constant 0 : i32
    return %c0_i32, %c0_i32_0, %c0_i32_1 : i32, i32, i32
  }
  func.func @transform_1(%arg0: i32) -> (i32, i32) {
    %c0_i32 = arith.constant 0 : i32
    %c0_i32_0 = arith.constant 0 : i32
    %c0_i32_1 = arith.constant 0 : i32
    return %c0_i32, %c0_i32_0 : i32, i32
  }
  func.func @transform_2(%arg0: i32) -> (i32, i32) {
    %c0_i32 = arith.constant 0 : i32
    %c0_i32_0 = arith.constant 0 : i32
    %c0_i32_1 = arith.constant 0 : i32
    return %c0_i32, %c0_i32_0 : i32, i32
  }
  func.func @transform_3(%arg0: i32) -> (i32, i32) {
    %c0_i32 = arith.constant 0 : i32
    %c0_i32_0 = arith.constant 0 : i32
    %c0_i32_1 = arith.constant 0 : i32
    return %c0_i32, %c0_i32_0 : i32, i32
  }
  func.func @transform_4(%arg0: i32) -> (i32, i32) {
    %c0_i32 = arith.constant 0 : i32
    %c0_i32_0 = arith.constant 0 : i32
    %c0_i32_1 = arith.constant 0 : i32
    return %c0_i32, %c0_i32_0 : i32, i32
  }
  func.func @transform_5(%arg0: i32) -> (i32, i32) {
    %c0_i32 = arith.constant 0 : i32
    %c0_i32_0 = arith.constant 0 : i32
    %c0_i32_1 = arith.constant 0 : i32
    return %c0_i32, %c0_i32_0 : i32, i32
  }
  func.func @transform_6(%arg0: i32) -> (i32, i32) {
    %c0_i32 = arith.constant 0 : i32
    %c0_i32_0 = arith.constant 0 : i32
    %c0_i32_1 = arith.constant 0 : i32
    return %c0_i32, %c0_i32_0 : i32, i32
  }
  func.func @transform_7(%arg0: i32) -> (i32, i32) {
    %c0_i32 = arith.constant 0 : i32
    %c0_i32_0 = arith.constant 0 : i32
    %c0_i32_1 = arith.constant 0 : i32
    return %c0_i32, %c0_i32_0 : i32, i32
  }
  func.func @transform_8(%arg0: i32) -> (i32, i32) {
    %c0_i32 = arith.constant 0 : i32
    %c0_i32_0 = arith.constant 0 : i32
    %c0_i32_1 = arith.constant 0 : i32
    return %c0_i32, %c0_i32_0 : i32, i32
  }
  func.func @transform_9(%arg0: i32) -> (i32, i32) {
    %c0_i32 = arith.constant 0 : i32
    %c0_i32_0 = arith.constant 0 : i32
    %c0_i32_1 = arith.constant 0 : i32
    return %c0_i32, %c0_i32_0 : i32, i32
  }
  func.func @transform_10(%arg0: i32) -> (i32, i32) {
    %c0_i32 = arith.constant 0 : i32
    %c0_i32_0 = arith.constant 0 : i32
    %c0_i32_1 = arith.constant 0 : i32
    return %c0_i32, %c0_i32_0 : i32, i32
  }
  func.func @transform_11(%arg0: i32) -> (i32, i32, i32) {
    %c0_i32 = arith.constant 0 : i32
    %c0_i32_0 = arith.constant 0 : i32
    %c0_i32_1 = arith.constant 0 : i32
    %c0_i32_2 = arith.constant 0 : i32
    return %c0_i32, %c0_i32_0, %c0_i32_1 : i32, i32, i32
  }
}

</mosaic_0001>

<bundles_post_ra>
// kernel: tpu_custom_call.1
= control target key start
LH: loop header
LB: loop body
LE: loop exit
PB: predicated region body
PF: predicated region fallthrough
CT: control target
= control target key end

     0   :  { %16 = vsyncpa [#allocation3], 0  ;;  %s1830_s0 = inlined_call_operand.hbm [shape: f32[2,8,128], index: 0, kind: input, shape index: {}]   ;;  %s1831_s1 = inlined_call_operand.hbm [shape: f32[128,384], index: 1, kind: input, shape index: {}]   ;;  %s1832_s2 = inlined_call_operand.hbm [shape: f32[128,128], index: 2, kind: input, shape index: {}]   ;;  %s1833_s3 = inlined_call_operand.hbm [shape: f32[128,128], index: 3, kind: input, shape index: {}]   ;;  %s1834_s4 = inlined_call_operand.vmem [shape: f32[1,128], index: 4, kind: input, shape index: {}]   ;;  %s1835_s5 = inlined_call_operand.hbm [shape: f32[128,128], index: 5, kind: input, shape index: {}]   ;;  %s1836_s6 = inlined_call_operand.vmem [shape: f32[1,128], index: 6, kind: input, shape index: {}]   ;;  %s1837_s7 = inlined_call_operand.vmem [shape: f32[1,128], index: 7, kind: input, shape index: {}]   ;;  %s1838_s8 = inlined_call_operand.vmem [shape: f32[1,128], index: 8, kind: input, shape index: {}]   ;;  %s1839_s9 = inlined_call_operand.vmem [shape: f32[1,128], index: 9, kind: input, shape index: {}]   ;;  %s1840_s10 = inlined_call_operand.vmem [shape: f32[1,128], index: 10, kind: input, shape index: {}]   ;;  %s1841_s11 = inlined_call_operand.hbm [shape: f32[2,8,128], index: 11, kind: output, shape index: {}]  }
   0x1   :  { %17 = vsyncpa [#allocation6], 0 }
   0x2   :  { %18 = vsyncpa [#allocation9], 0 }
   0x3   :  { %19 = vsyncpa [#allocation4], 0  ;;  %s1616_s17 = smov [#allocation5]   ;;  %s1476_s21 = scalar_lea.hbm %s1831_s1, 6144 }
   0x4   :  { %s37_s18 = sshll.u32 %s1616_s17, 4  ;;  %p1477_p0 = scmp.ne.s32.totalorder %s1831_s1, %s1476_s21  ;;  %s38_s18 = int_to_ptr.vmem [resolvable:$true] %s37_s18 }
   0x5   :  { %p1480_p1 = scmp.lt.u32.totalorder %s1476_s21, %s1831_s1 }
   0x7   :  { %p1482_p2 = pnand %p1480_p1, %p1477_p0 }
   0x9   :  { %1485 = shalt.err (!%p1482_p2)
}
   0xa   :  { %s1486_s26 = scalar_lea.vmem %s38_s18, 6144  ;;  %p1491_p4 = scmp.lt.s32.totalorder %s38_s18, %s38_s18 }
   0xb   :  { %p1487_p3 = scmp.ne.s32.totalorder %s38_s18, %s1486_s26  ;;  %p1492_p5 = scmp.lt.s32.totalorder %s1486_s26, %s1486_s26 }
   0xd   :  { %p1493_p6 = por %p1492_p5, %p1491_p4 }
   0xf   :  { %p1494_p7 = pnand %p1493_p6, %p1487_p3 }
  0x11   :  { %1497 = shalt.err (!%p1494_p7)
}
  0x12   :  { %s1617_s27 = smov 384   ;;  %s1618_s28 = smov 24  }
  0x13   :  { %43 = dma.hbm_to_vmem [thread:$0]  %s1831_s1, 6144, %s38_s18, [#allocation6], %s1617_s27, %s1617_s27, %s1618_s28  }
  0x14   :  { %s1619_s12 = smov [#allocation8]   ;;  %s1620_s14 = smov [#allocation2]  }
  0x15   :  { %s61_s13 = sshll.u32 %s1619_s12, 4  ;;  %s25_s15 = sshll.u32 %s1620_s14, 4  ;;  %s62_s13 = int_to_ptr.vmem [resolvable:$true] %s61_s13  ;;  %s26_s15 = int_to_ptr.vmem [resolvable:$true] %s25_s15 }
  0x16   :  { %s1498_s19 = scalar_lea.hbm %s1833_s3, 2048 }
  0x17   :  { %p1499_p8 = scmp.ne.s32.totalorder %s1833_s3, %s1498_s19  ;;  %p1502_p9 = scmp.lt.u32.totalorder %s1498_s19, %s1833_s3 }
  0x19   :  { %p1504_p10 = pnand %p1502_p9, %p1499_p8 }
  0x1b   :  { %1507 = shalt.err (!%p1504_p10)
}
  0x1c   :  { %s1508_s1 = scalar_lea.vmem %s62_s13, 2048  ;;  %p1513_p12 = scmp.lt.s32.totalorder %s62_s13, %s62_s13 }
  0x1d   :  { %p1509_p11 = scmp.ne.s32.totalorder %s62_s13, %s1508_s1  ;;  %p1514_p13 = scmp.lt.s32.totalorder %s1508_s1, %s1508_s1 }
  0x1f   :  { %p1515_p0 = por %p1514_p13, %p1513_p12 }
  0x21   :  { %p1516_p1 = pnand %p1515_p0, %p1509_p11 }
  0x23   :  { %1519 = shalt.err (!%p1516_p1)
}
  0x24   :  { %s1621_s18 = smov 128   ;;  %s1622_s24 = smov 8  }
  0x25   :  { %67 = dma.hbm_to_vmem [thread:$0]  %s1833_s3, 2048, %s62_s13, [#allocation9], %s1621_s18, %s1621_s18, %s1622_s24  }
  0x26   :  { %s1520_s29 = scalar_lea.hbm %s1830_s0, 256 }
  0x27   :  { %p1521_p2 = scmp.ne.s32.totalorder %s1830_s0, %s1520_s29  ;;  %p1524_p3 = scmp.lt.u32.totalorder %s1520_s29, %s1830_s0 }
  0x29   :  { %p1526_p4 = pnand %p1524_p3, %p1521_p2 }
  0x2b   :  { %1529 = shalt.err (!%p1526_p4)
}
  0x2c   :  { %s1530_s17 = scalar_lea.vmem %s26_s15, 256  ;;  %p1535_p6 = scmp.lt.s32.totalorder %s26_s15, %s26_s15 }
  0x2d   :  { %p1531_p5 = scmp.ne.s32.totalorder %s26_s15, %s1530_s17  ;;  %p1536_p7 = scmp.lt.s32.totalorder %s1530_s17, %s1530_s17 }
  0x2f   :  { %p1537_p8 = por %p1536_p7, %p1535_p6 }
  0x31   :  { %p1538_p9 = pnand %p1537_p8, %p1531_p5 }
  0x33   :  { %1541 = shalt.err (!%p1538_p9)
}
  0x34   :  { %31 = dma.hbm_to_vmem [thread:$0]  %s1830_s0, 256, %s26_s15, [#allocation3], %s1621_s18, %s1621_s18, %s1622_s24  }
  0x35   :  { %s1623_s19 = smov [#allocation7]   ;;  %s1624_s21 = smov [#allocation10]  }
  0x36   :  { %s49_s20 = sshll.u32 %s1623_s19, 4  ;;  %s75_s22 = sshll.u32 %s1624_s21, 4  ;;  %s50_s20 = int_to_ptr.vmem [resolvable:$true] %s49_s20  ;;  %s76_s22 = int_to_ptr.vmem [resolvable:$true] %s75_s22 }
  0x37   :  { %s1542_s25 = scalar_lea.hbm %s1832_s2, 2048 }
  0x38   :  { %p1543_p10 = scmp.ne.s32.totalorder %s1832_s2, %s1542_s25  ;;  %p1546_p11 = scmp.lt.u32.totalorder %s1542_s25, %s1832_s2 }
  0x3a   :  { %p1548_p12 = pnand %p1546_p11, %p1543_p10 }
  0x3c   :  { %1551 = shalt.err (!%p1548_p12)
}
  0x3d   :  { %s1552_s0 = scalar_lea.vmem %s50_s20, 2048  ;;  %p1557_p0 = scmp.lt.s32.totalorder %s50_s20, %s50_s20 }
  0x3e   :  { %p1553_p13 = scmp.ne.s32.totalorder %s50_s20, %s1552_s0  ;;  %p1558_p1 = scmp.lt.s32.totalorder %s1552_s0, %s1552_s0 }
  0x40   :  { %p1559_p2 = por %p1558_p1, %p1557_p0 }
  0x42   :  { %p1560_p3 = pnand %p1559_p2, %p1553_p13 }
  0x44   :  { %1563 = shalt.err (!%p1560_p3)
}
  0x45   :  { %55 = dma.hbm_to_vmem [thread:$0]  %s1832_s2, 2048, %s50_s20, [#allocation6], %s1621_s18, %s1621_s18, %s1622_s24  }
  0x46   :  { %s1564_s16 = scalar_lea.hbm %s1835_s5, 2048 }
  0x47   :  { %p1565_p4 = scmp.ne.s32.totalorder %s1835_s5, %s1564_s16  ;;  %p1568_p5 = scmp.lt.u32.totalorder %s1564_s16, %s1835_s5 }
  0x49   :  { %p1570_p6 = pnand %p1568_p5, %p1565_p4 }
  0x4b   :  { %1573 = shalt.err (!%p1570_p6)
}
  0x4c   :  { %s1574_s21 = scalar_lea.vmem %s76_s22, 2048  ;;  %p1579_p8 = scmp.lt.s32.totalorder %s76_s22, %s76_s22 }
  0x4d   :  { %p1575_p7 = scmp.ne.s32.totalorder %s76_s22, %s1574_s21  ;;  %p1580_p9 = scmp.lt.s32.totalorder %s1574_s21, %s1574_s21 }
  0x4f   :  { %p1581_p10 = por %p1580_p9, %p1579_p8 }
  0x51   :  { %p1582_p11 = pnand %p1581_p10, %p1575_p7 }
  0x53   :  { %1585 = shalt.err (!%p1582_p11)
}
  0x54   :  { %81 = dma.hbm_to_vmem [thread:$0]  %s1835_s5, 2048, %s76_s22, [#allocation9], %s1621_s18, %s1621_s18, %s1622_s24  }
  0x55   :  { %1608 = dma.done.wait [#allocation3], 256  }
  0x56   :  { %1609 = vsyncadd [#allocation3], 4294967040 }
  0x57   :  { %1610 = dma.done.wait [#allocation6], 8192  }
  0x58   :  { %1611 = vsyncadd [#allocation6], 4294959104 }
  0x59   :  { %1612 = dma.done.wait [#allocation9], 4096  }
  0x5a   :  { %1613 = vsyncadd [#allocation9], 4294963200  ;;  %v1625_v0 = vmov 0.0   ;;  %v110_v1 = vld [vmem:[#allocation5 + $0x8] sm:$0xff]  ;;  %v113_v2 = vld [vmem:[#allocation5 + $0x20] sm:$0xff]  ;;  %vm1626_vm0 = vmmov 0  }
  0x5b   :  { %221 = vmatprep.mubr.f32.mxu0 %v1625_v0  ;;  %v109_v3 = vld [vmem:[#allocation5] sm:$0xff]  ;;  %v1284_v4 = vpack.c.bf16 %v113_v2, %v110_v1  ;;  %v112_v5 = vld [vmem:[#allocation5 + $0x18] sm:$0xff]  ;;  %v119_v7 = vld [vmem:[#allocation5 + $0x50] sm:$0xff]  ;;  %vm451_vm1 = vcmask 64512   ;;  %s1627_s29 = smov [#allocation11]  }
  0x5c   :  { %v116_v6 = vld [vmem:[#allocation5 + $0x38] sm:$0xff]  ;;  %v1286_v8 = vpack.c.bf16 %v112_v5, %v109_v3  ;;  %v115_v10 = vld [vmem:[#allocation5 + $0x30] sm:$0xff]  ;;  %v118_v11 = vld [vmem:[#allocation5 + $0x48] sm:$0xff]  ;;  %s1019_s0 = sshll.u32 %s1627_s29, 4  ;;  %s1020_s0 = int_to_ptr.vmem [resolvable:$true] %s1019_s0 }
  0x5d   :  { %v1288_v9 = vpack.c.bf16 %v119_v7, %v116_v6  ;;  %v122_v12 = vld [vmem:[#allocation5 + $0x68] sm:$0xff]  ;;  %1285 = vmatprep.subr.bf16.mxu0 %v1284_v4  ;;  %v125_v13 = vld [vmem:[#allocation5 + $0x80] sm:$0xff]  ;;  %v1290_v14 = vpack.c.bf16 %v118_v11, %v115_v10  ;;  %v124_v17 = vld [vmem:[#allocation5 + $0x78] sm:$0xff]  ;;  %s1586_s15 = scalar_lea.vmem %s1020_s0, 256  ;;  %p1591_p13 = scmp.lt.s32.totalorder %s1020_s0, %s1020_s0 }
  0x5e   :  { %1287 = vmatpush1.bf16.msra.mxu0 %v1286_v8  ;;  %v1292_v15 = vpack.c.bf16 %v125_v13, %v122_v12  ;;  %v121_v16 = vld [vmem:[#allocation5 + $0x60] sm:$0xff]  ;;  %v128_v18 = vld [vmem:[#allocation5 + $0x98] sm:$0xff]  ;;  %v131_v19 = vld [vmem:[#allocation5 + $0xb0] sm:$0xff]  ;;  %p1587_p12 = scmp.ne.s32.totalorder %s1020_s0, %s1586_s15  ;;  %p1592_p0 = scmp.lt.s32.totalorder %s1586_s15, %s1586_s15 }
  0x5f   :  { %1289 = vmatprep.subr.bf16.mxu0 %v1288_v9  ;;  %v1294_v20 = vpack.c.bf16 %v124_v17, %v121_v16  ;;  %v1296_v21 = vpack.c.bf16 %v131_v19, %v128_v18  ;;  %v127_v22 = vld [vmem:[#allocation5 + $0x90] sm:$0xff]  ;;  %v130_v23 = vld [vmem:[#allocation5 + $0xa8] sm:$0xff]  ;;  %v137_v25 = vld [vmem:[#allocation5 + $0xe0] sm:$0xff] }
  0x60   :  { %v134_v24 = vld [vmem:[#allocation5 + $0xc8] sm:$0xff]  ;;  %v1761_v26 = vld [vmem:[#allocation2] sm:$0xff]  ;;  %v1298_v27 = vpack.c.bf16 %v130_v23, %v127_v22  ;;  %v133_v29 = vld [vmem:[#allocation5 + $0xc0] sm:$0xff]  ;;  %p1593_p1 = por %p1592_p0, %p1591_p13 }
  0x61   :  { %1156 = vmatprep.mubr.f32.mxu1 %v1761_v26  ;;  %v1300_v28 = vpack.c.bf16 %v137_v25, %v134_v24  ;;  %v136_v30 = vld [vmem:[#allocation5 + $0xd8] sm:$0xff]  ;;  %v143_v32 = vld [vmem:[#allocation5 + $0x110] sm:$0xff]  ;;  %v142_v36 = vld [vmem:[#allocation5 + $0x108] sm:$0xff] }
  0x62   :  { %1291 = vmatpush1.bf16.msra.mxu0 %v1290_v14  ;;  %v140_v31 = vld [vmem:[#allocation5 + $0xf8] sm:$0xff]  ;;  %v1302_v33 = vpack.c.bf16 %v136_v30, %v133_v29  ;;  %v139_v35 = vld [vmem:[#allocation5 + $0xf0] sm:$0xff]  ;;  %v146_v37 = vld [vmem:[#allocation5 + $0x128] sm:$0xff]  ;;  %p1594_p2 = pnand %p1593_p1, %p1587_p12 }
  0x63   :  { %1293 = vmatprep.subr.bf16.mxu0 %v1292_v15  ;;  %v1304_v34 = vpack.c.bf16 %v143_v32, %v140_v31  ;;  %v149_v38 = vld [vmem:[#allocation5 + $0x140] sm:$0xff]  ;;  %v1306_v39 = vpack.c.bf16 %v142_v36, %v139_v35  ;;  %v148_v42 = vld [vmem:[#allocation5 + $0x138] sm:$0xff]  ;;  %v155_v44 = vld [vmem:[#allocation5 + $0x170] sm:$0xff] }
  0x64   :  { %v1308_v40 = vpack.c.bf16 %v149_v38, %v146_v37  ;;  %v145_v41 = vld [vmem:[#allocation5 + $0x120] sm:$0xff]  ;;  %v152_v43 = vld [vmem:[#allocation5 + $0x158] sm:$0xff]  ;;  %v151_v47 = vld [vmem:[#allocation5 + $0x150] sm:$0xff] }
  0x65   :  { %v1310_v45 = vpack.c.bf16 %v148_v42, %v145_v41  ;;  %v1312_v46 = vpack.c.bf16 %v155_v44, %v152_v43  ;;  %v154_v48 = vld [vmem:[#allocation5 + $0x168] sm:$0xff]  ;;  %v1767_v50 = vld [vmem:[#allocation2 + $0x8] sm:$0xff]  ;;  %v111_v55 = vld [vmem:[#allocation5 + $0x10] sm:$0xff] }
  0x66   :  { %1295 = vmatpush1.bf16.msra.mxu0 %v1294_v20  ;;  %v1314_v49 = vpack.c.bf16 %v154_v48, %v151_v47  ;;  %v114_v56 = vld [vmem:[#allocation5 + $0x28] sm:$0xff]  ;;  %v117_v57 = vld [vmem:[#allocation5 + $0x40] sm:$0xff]  ;;  %v120_v59 = vld [vmem:[#allocation5 + $0x58] sm:$0xff] }
  0x67   :  { %1297 = vmatprep.subr.bf16.mxu0 %v1296_v21  ;;  %v1316_v58 = vpack.c.bf16 %v114_v56, %v111_v55  ;;  %v1320_v60 = vpack.c.bf16 %v120_v59, %v117_v57  ;;  %v123_v61 = vld [vmem:[#allocation5 + $0x70] sm:$0xff]  ;;  %v126_v62 = vld [vmem:[#allocation5 + $0x88] sm:$0xff]  ;;  %v129_v1 = vld [vmem:[#allocation5 + $0xa0] sm:$0xff] }
  0x68   :  { %v1324_v63 = vpack.c.bf16 %v126_v62, %v123_v61  ;;  %v132_v2 = vld [vmem:[#allocation5 + $0xb8] sm:$0xff]  ;;  %v135_v4 = vld [vmem:[#allocation5 + $0xd0] sm:$0xff]  ;;  %v138_v5 = vld [vmem:[#allocation5 + $0xe8] sm:$0xff] }
  0x69   :  { %1317 = vmatprep.subr.bf16.mxu1 %v1316_v58  ;;  %v1328_v3 = vpack.c.bf16 %v132_v2, %v129_v1  ;;  %v1332_v6 = vpack.c.bf16 %v138_v5, %v135_v4  ;;  %v141_v7 = vld [vmem:[#allocation5 + $0x100] sm:$0xff]  ;;  %v144_v8 = vld [vmem:[#allocation5 + $0x118] sm:$0xff]  ;;  %v147_v10 = vld [vmem:[#allocation5 + $0x130] sm:$0xff] }
  0x6a   :  { %1299 = vmatpush1.bf16.msra.mxu0 %v1298_v27  ;;  %1319 = vmatpush3.bf16.msra.mxu1 %v1316_v58  ;;  %v1336_v9 = vpack.c.bf16 %v144_v8, %v141_v7  ;;  %v150_v11 = vld [vmem:[#allocation5 + $0x148] sm:$0xff]  ;;  %v153_v13 = vld [vmem:[#allocation5 + $0x160] sm:$0xff]  ;;  %v156_v14 = vld [vmem:[#allocation5 + $0x178] sm:$0xff] }
  0x6b   :  { %1301 = vmatprep.subr.bf16.mxu0 %v1300_v28  ;;  %1321 = vmatprep.subr.bf16.mxu1 %v1320_v60  ;;  %v1340_v12 = vpack.c.bf16 %v150_v11, %v147_v10  ;;  %v1344_v15 = vpack.c.bf16 %v156_v14, %v153_v13  ;;  %v620_v37 = vld [vmem:[#allocation7] sm:$0xff]  ;;  %v621_v38 = vld [vmem:[#allocation7 + $0x8] sm:$0xff]  ;;  %v623_v41 = vld [vmem:[#allocation7 + $0x18] sm:$0xff] }
  0x6c   :  { %v624_v43 = vld [vmem:[#allocation7 + $0x20] sm:$0xff]  ;;  %v625_v44 = vld [vmem:[#allocation7 + $0x28] sm:$0xff]  ;;  %v627_v47 = vld [vmem:[#allocation7 + $0x38] sm:$0xff] }
  0x6d   :  { %v632_v56 = vld [vmem:[#allocation7 + $0x60] sm:$0xff]  ;;  %v633_v57 = vld [vmem:[#allocation7 + $0x68] sm:$0xff]  ;;  %v634_v2 = vld [vmem:[#allocation7 + $0x70] sm:$0xff] }
  0x6e   :  { %1303 = vmatpush1.bf16.msra.mxu0 %v1302_v33  ;;  %1323 = vmatpush3.bf16.msra.mxu1 %v1320_v60  ;;  %v1372_v58 = vpack.c.bf16 %v633_v57, %v632_v56  ;;  %v760_v13 = vld [vmem:[#allocation8] sm:$0xff]  ;;  %v761_v14 = vld [vmem:[#allocation8 + $0x8] sm:$0xff] }
  0x6f   :  { %1305 = vmatprep.subr.bf16.mxu0 %v1304_v34  ;;  %1325 = vmatprep.subr.bf16.mxu1 %v1324_v63  ;;  %v875_v56 = vld [vmem:[#allocation10 + $0x28] sm:$0xff] }
  0x72   :  { %1307 = vmatpush1.bf16.msra.mxu0 %v1306_v39  ;;  %1327 = vmatpush3.bf16.msra.mxu1 %v1324_v63  ;;  %v622_v39 = vld [vmem:[#allocation7 + $0x10] sm:$0xff] }
  0x73   :  { %1309 = vmatprep.subr.bf16.mxu0 %v1308_v40  ;;  %1329 = vmatprep.subr.bf16.mxu1 %v1328_v3  ;;  %v1348_v40 = vpack.c.bf16 %v621_v38, %v620_v37  ;;  %v1352_v42 = vpack.c.bf16 %v623_v41, %v622_v39  ;;  %v768_v37 = vld [vmem:[#allocation8 + $0x40] sm:$0xff]  ;;  %v769_v38 = vld [vmem:[#allocation8 + $0x48] sm:$0xff]  ;;  %v770_v39 = vld [vmem:[#allocation8 + $0x50] sm:$0xff] }
  0x76   :  { %1311 = vmatpush1.bf16.msra.mxu0 %v1310_v45  ;;  %1331 = vmatpush3.bf16.msra.mxu1 %v1328_v3  ;;  %v1356_v45 = vpack.c.bf16 %v625_v44, %v624_v43  ;;  %v635_v3 = vld [vmem:[#allocation7 + $0x78] sm:$0xff]  ;;  %v773_v43 = vld [vmem:[#allocation8 + $0x68] sm:$0xff] }
  0x77   :  { %1313 = vmatprep.subr.bf16.mxu0 %v1312_v46  ;;  %1333 = vmatprep.subr.bf16.mxu1 %v1332_v6  ;;  %v626_v46 = vld [vmem:[#allocation7 + $0x30] sm:$0xff]  ;;  %v1376_v4 = vpack.c.bf16 %v635_v3, %v634_v2 }
  0x78   :  { %v1360_v48 = vpack.c.bf16 %v627_v47, %v626_v46  ;;  %v775_v46 = vld [vmem:[#allocation8 + $0x78] sm:$0xff]  ;;  %v1036_v2 = vld [vmem:[%s1837_s7] ss:$0 sm:$0xff] }
  0x7a   :  { %1315 = vmatpush1.bf16.msra.mxu0 %v1314_v49  ;;  %1335 = vmatpush3.bf16.msra.mxu1 %v1332_v6  ;;  %v628_v49 = vld [vmem:[#allocation7 + $0x40] sm:$0xff] }
  0x7b   :  { %1159 = vmatprep.subr.mxu0 %v1625_v0  ;;  %1337 = vmatprep.subr.bf16.mxu1 %v1336_v9 }
  0x7d   :  { %222 = vmatmul.mubr.f32.vlgmr.msra.gmra.mrb[0].mxu0 %v1761_v26 }
  0x7e   :  { %227 = vmatprep.mubr.f32.mxu0 %v1625_v0  ;;  %1339 = vmatpush3.bf16.msra.mxu1 %v1336_v9 }
  0x7f   :  { %1341 = vmatprep.subr.bf16.mxu1 %v1340_v12 }
  0x81   :  { %228 = vmatmul.mubr.f32.gmra.mrb[2].mxu0 %v1767_v50 }
  0x82   :  { %1161 = vmatprep.mubr.msk.f32.mxu0 %vm1626_vm0, %v1625_v0  ;;  %1343 = vmatpush3.bf16.msra.mxu1 %v1340_v12 }
  0x83   :  { %1345 = vmatprep.subr.bf16.mxu1 %v1344_v15 }
  0x86   :  { %1347 = vmatpush3.bf16.msra.mxu1 %v1344_v15  ;;  %v762_v15 = vld [vmem:[#allocation8 + $0x10] sm:$0xff] }
  0x87   :  { %1349 = vmatprep.subr.bf16.mxu1 %v1348_v40 }
  0x89   :  { %1157 = vmatmul.mubr.f32.vlgmr.msra.gmra.mrb[0].mxu1 %v1767_v50 }
  0x8a   :  { %1351 = vmatpush3.bf16.msra.mxu1 %v1348_v40  ;;  %v771_v40 = vld [vmem:[#allocation8 + $0x58] sm:$0xff] }
  0x8b   :  { %1353 = vmatprep.subr.bf16.mxu1 %v1352_v42  ;;  %v1400_v41 = vpack.c.bf16 %v771_v40, %v770_v39  ;;  %v1041_v40 = vld [vmem:[%s1836_s6] ss:$0 sm:$0xff] }
  0x8e   :  { %1355 = vmatpush3.bf16.msra.mxu1 %v1352_v42  ;;  %v772_v42 = vld [vmem:[#allocation8 + $0x60] sm:$0xff] }
  0x8f   :  { %1357 = vmatprep.subr.bf16.mxu1 %v1356_v45  ;;  %v1404_v44 = vpack.c.bf16 %v773_v43, %v772_v42 }
  0x92   :  { %1359 = vmatpush3.bf16.msra.mxu1 %v1356_v45  ;;  %v774_v45 = vld [vmem:[#allocation8 + $0x70] sm:$0xff] }
  0x93   :  { %1361 = vmatprep.subr.bf16.mxu1 %v1360_v48  ;;  %v1408_v47 = vpack.c.bf16 %v775_v46, %v774_v45 }
  0x96   :  { %1363 = vmatpush3.bf16.msra.mxu1 %v1360_v48  ;;  %v870_v48 = vld [vmem:[#allocation10] sm:$0xff] }
 0x150   :  { %v223_v51 = vpop.f32.mrb[0].mxu0 }
 0x151   :  { %v225_v52 = vpop.f32.mrb[1].mxu0 }
 0x152   :  { %1160 = vmatpush3.xpose.msra.mxu0 %v225_v52 }
 0x153   :  { %1164 = vmatprep.subr.mxu0 %v1625_v0 }
 0x154   :  { %v229_v53 = vpop.f32.mrb[2].mxu0 }
 0x155   :  { %v231_v54 = vpop.f32.mrb[3].mxu0  ;;  %1162 = vmatmul.mubr.f32.vlgmr.msra.gmra.mrb[4].mxu0 %v223_v51  ;;  %v629_v51 = vld [vmem:[#allocation7 + $0x48] sm:$0xff] }
 0x156   :  { %1165 = vmatpush3.xpose.msra.mxu0 %v231_v54  ;;  %1166 = vmatprep.mubr.msk.f32.mxu0 %vm1626_vm0, %v1625_v0  ;;  %v1364_v52 = vpack.c.bf16 %v629_v51, %v628_v49  ;;  %v631_v54 = vld [vmem:[#allocation7 + $0x58] sm:$0xff]  ;;  %v871_v49 = vld [vmem:[#allocation10 + $0x8] sm:$0xff]  ;;  %v872_v51 = vld [vmem:[#allocation10 + $0x10] sm:$0xff] }
 0x157   :  { %1169 = vmatprep.subr.mxu0 %v1625_v0 }
 0x158   :  { %1365 = vmatprep.subr.bf16.mxu1 %v1364_v52 }
 0x159   :  { %1167 = vmatmul.mubr.f32.vlgmr.msra.gmra.mrb[6].mxu0 %v229_v53  ;;  %v630_v53 = vld [vmem:[#allocation7 + $0x50] sm:$0xff]  ;;  %1367 = vmatpush3.bf16.msra.mxu1 %v1364_v52  ;;  %v1412_v52 = vpack.c.bf16 %v871_v49, %v870_v48 }
 0x15a   :  { %1171 = vmatprep.mubr.msk.f32.mxu0 %vm1626_vm0, %v1625_v0  ;;  %v1368_v55 = vpack.c.bf16 %v631_v54, %v630_v53  ;;  %v873_v53 = vld [vmem:[#allocation10 + $0x18] sm:$0xff] }
 0x15b   :  { %v1416_v54 = vpack.c.bf16 %v873_v53, %v872_v51 }
 0x15c   :  { %v1158_v35 = vpop.f32.mrb[0].mxu1  ;;  %1369 = vmatprep.subr.bf16.mxu1 %v1368_v55 }
 0x15d   :  { %v300_v36 = vpop.f32.mrb[1].mxu1  ;;  %1371 = vmatpush3.bf16.msra.mxu1 %v1368_v55  ;;  %v874_v55 = vld [vmem:[#allocation10 + $0x20] sm:$0xff] }
 0x15e   :  { %1170 = vmatpush3.msra.mxu0 %v300_v36  ;;  %1373 = vmatprep.subr.bf16.mxu1 %v1372_v58  ;;  %v1420_v57 = vpack.c.bf16 %v875_v56, %v874_v55 }
 0x15f   :  { %1174 = vmatprep.subr.mxu0 %v1625_v0 }
 0x161   :  { %1375 = vmatpush3.bf16.msra.mxu1 %v1372_v58 }
 0x162   :  { %1377 = vmatprep.subr.bf16.mxu1 %v1376_v4 }
 0x165   :  { %1379 = vmatpush3.bf16.msra.mxu1 %v1376_v4 }
 0x166   :  { %1413 = vmatprep.subr.bf16.mxu1 %v1412_v52 }
 0x228   :  { %v375_v16 = vpop.f32.mrb[4].mxu0 }
 0x229   :  { %v449_v17 = vmul.f32 0.17677669, %v375_v16  ;;  %v1163_v18 = vpop.f32.mrb[5].mxu0  ;;  %v1380_v16 = vpack.c.bf16 %v761_v14, %v760_v13  ;;  %v878_v14 = vld [vmem:[#allocation10 + $0x40] sm:$0xff] }
 0x22b   :  { %v452_v19 = vsel %vm451_vm1, %v449_v17, -inf }
 0x22c   :  { %453 = vmax.xlane.f32.xlu0 %v452_v19  ;;  %v445_v20 = vpop.f32.mrb[6].mxu0  ;;  %v764_v19 = vld [vmem:[#allocation8 + $0x20] sm:$0xff] }
 0x22d   :  { %v450_v21 = vmul.f32 0.17677669, %v445_v20  ;;  %v1168_v22 = vpop.f32.mrb[7].mxu0  ;;  %v765_v20 = vld [vmem:[#allocation8 + $0x28] sm:$0xff] }
 0x22f   :  { %v455_v23 = vsel %vm451_vm1, %v450_v21, -inf }
 0x230   :  { %456 = vmax.xlane.f32.xlu0 %v455_v23 }
 0x2b9   :  { %v454_v24 = vpop.xlane.xlu0 %453 }
 0x2ba   :  { %v458_v25 = vsub.f32 %v449_v17, %v454_v24  ;;  %v763_v17 = vld [vmem:[#allocation8 + $0x18] sm:$0xff] }
 0x2bb   :  { %v1384_v18 = vpack.c.bf16 %v763_v17, %v762_v15  ;;  %v879_v15 = vld [vmem:[#allocation10 + $0x48] sm:$0xff]  ;;  %v880_v17 = vld [vmem:[#allocation10 + $0x50] sm:$0xff] }
 0x2bc   :  { %v460_v27 = vmul.f32 1.442695, %v458_v25 }
 0x2bd   :  { %v457_v28 = vpop.xlane.xlu0 %456 }
 0x2be   :  { %1456 = vpow2.f32 %v460_v27  ;;  %v459_v29 = vsub.f32 %v450_v21, %v457_v28  ;;  %v1388_v21 = vpack.c.bf16 %v765_v20, %v764_v19  ;;  %v882_v19 = vld [vmem:[#allocation10 + $0x60] sm:$0xff] }
 0x2c0   :  { %v462_v30 = vmul.f32 1.442695, %v459_v29 }
 0x2c2   :  { %1458 = vpow2.f32 %v462_v30 }
 0x2c8   :  { %v1457_v31 = vpop.eup %1456 }
 0x2c9   :  { %v464_v32 = vsel %vm451_vm1, %v1457_v31, 0.0 }
 0x2ca   :  { %465 = vadd.xlane.f32.xlu1 %v464_v32 }
 0x2cc   :  { %v1459_v33 = vpop.eup %1458 }
 0x2cd   :  { %v467_v34 = vsel %vm451_vm1, %v1459_v33, 0.0 }
 0x2ce   :  { %468 = vadd.xlane.f32.xlu1 %v467_v34  ;;  %v766_v34 = vld [vmem:[#allocation8 + $0x30] sm:$0xff] }
 0x357   :  { %v466_v59 = vpop.xlane.xlu1 %465 }
 0x358   :  { %1460 = vrcp.f32 %v466_v59 }
 0x35b   :  { %v469_v60 = vpop.xlane.xlu1 %468 }
 0x35c   :  { %1462 = vrcp.f32 %v469_v60 }
 0x362   :  { %v1461_v61 = vpop.eup %1460 }
 0x363   :  { %v472_v62 = vmul.f32 %v1461_v61, %v1457_v31 }
 0x365   :  { %1172 = vmatmul.mubr.msk.f32.vlgmr.msra.gmra.mrb[8].mxu0 %vm451_vm1, %v472_v62 }
 0x366   :  { %v1463_v63 = vpop.eup %1462  ;;  %1175 = vmatpush3.msra.mxu0 %v1158_v35  ;;  %1176 = vmatprep.mubr.msk.f32.mxu0 %vm1626_vm0, %v1625_v0  ;;  %v767_v35 = vld [vmem:[#allocation8 + $0x38] sm:$0xff] }
 0x367   :  { %v473_v1 = vmul.f32 %v1463_v63, %v1459_v33  ;;  %1381 = vmatprep.subr.bf16.mxu0 %v1380_v16  ;;  %v1392_v36 = vpack.c.bf16 %v767_v35, %v766_v34 }
 0x369   :  { %1177 = vmatmul.mubr.msk.f32.vlgmr.msra.gmra.mrb[10].mxu0 %vm451_vm1, %v473_v1 }
 0x36a   :  { %1383 = vmatpush3.bf16.msra.mxu0 %v1380_v16  ;;  %v1428_v16 = vpack.c.bf16 %v879_v15, %v878_v14 }
 0x36b   :  { %1385 = vmatprep.subr.bf16.mxu0 %v1384_v18 }
 0x36e   :  { %1387 = vmatpush3.bf16.msra.mxu0 %v1384_v18  ;;  %v881_v18 = vld [vmem:[#allocation10 + $0x58] sm:$0xff] }
 0x36f   :  { %1389 = vmatprep.subr.bf16.mxu0 %v1388_v21  ;;  %v1432_v20 = vpack.c.bf16 %v881_v18, %v880_v17 }
 0x372   :  { %1391 = vmatpush3.bf16.msra.mxu0 %v1388_v21  ;;  %v883_v21 = vld [vmem:[#allocation10 + $0x68] sm:$0xff] }
 0x373   :  { %1393 = vmatprep.subr.bf16.mxu0 %v1392_v36 }
 0x376   :  { %1395 = vmatpush3.bf16.msra.mxu0 %v1392_v36 }
 0x438   :  { %v543_v5 = vpop.f32.mrb[8].mxu0 }
 0x439   :  { %v1173_v6 = vpop.f32.mrb[9].mxu0  ;;  %1211 = vmatprep.mubr.f32.mxu1 %v543_v5 }
 0x43a   :  { %v1037_v6 = vld [vmem:[%s1838_s8] ss:$0 sm:$0xff] }
 0x43c   :  { %v616_v7 = vpop.f32.mrb[10].mxu0 }
 0x43d   :  { %v1178_v8 = vpop.f32.mrb[11].mxu0  ;;  %1212 = vmatmul.mubr.f32.vlgmr.msra.gmra.mrb[2].mxu1 %v616_v7 }
 0x43e   :  { %1415 = vmatpush3.bf16.msra.mxu1 %v1412_v52 }
 0x43f   :  { %1417 = vmatprep.subr.bf16.mxu1 %v1416_v54 }
 0x442   :  { %1419 = vmatpush3.bf16.msra.mxu1 %v1416_v54 }
 0x443   :  { %1421 = vmatprep.subr.bf16.mxu1 %v1420_v57 }
 0x446   :  { %1423 = vmatpush3.bf16.msra.mxu1 %v1420_v57 }
 0x510   :  { %v1213_v9 = vpop.f32.mrb[2].mxu1 }
 0x511   :  { %v717_v10 = vadd.f32 %v1213_v9, %v1767_v50  ;;  %v702_v11 = vpop.f32.mrb[3].mxu1  ;;  %v711_v50 = vlaneseq }
 0x512   :  { %v716_v12 = vadd.f32 %v702_v11, %v1761_v26  ;;  %v876_v11 = vld [vmem:[#allocation10 + $0x30] sm:$0xff] }
 0x513   :  { %722 = vadd.xlane.f32.xlu1 %v717_v10  ;;  %v712_v22 = vand.u32 127, %v711_v50  ;;  %v1436_v50 = vpack.c.bf16 %v883_v21, %v882_v19 }
 0x514   :  { %720 = vadd.xlane.f32.xlu0 %v716_v12 }
 0x515   :  { %vm713_vm2 = vcmp.lt.s32.totalorder %v712_v22, 32  ;;  %v884_v22 = vld [vmem:[#allocation10 + $0x70] sm:$0xff] }
 0x516   :  { %v1791_v27 = vsel %vm713_vm2, 1.0, %v1625_v0  ;;  %v1396_v0 = vpack.c.bf16 %v769_v38, %v768_v37 }
 0x518   :  { %1397 = vmatprep.subr.bf16.mxu0 %v1396_v0 }
 0x519   :  { %1399 = vmatpush3.bf16.msra.mxu0 %v1396_v0 }
 0x51a   :  { %1401 = vmatprep.subr.bf16.mxu0 %v1400_v41 }
 0x51d   :  { %1403 = vmatpush3.bf16.msra.mxu0 %v1400_v41 }
 0x51e   :  { %1405 = vmatprep.subr.bf16.mxu0 %v1404_v44 }
 0x521   :  { %1407 = vmatpush3.bf16.msra.mxu0 %v1404_v44 }
 0x522   :  { %1409 = vmatprep.subr.bf16.mxu0 %v1408_v47 }
 0x525   :  { %1411 = vmatpush3.bf16.msra.mxu0 %v1408_v47 }
 0x5a0   :  { %v723_v26 = vpop.xlane.xlu1 %722 }
 0x5a1   :  { %v725_v23 = vmul.f32 0.03125, %v723_v26  ;;  %v721_v24 = vpop.xlane.xlu0 %720  ;;  %v885_v26 = vld [vmem:[#allocation10 + $0x78] sm:$0xff] }
 0x5a2   :  { %v724_v25 = vmul.f32 0.03125, %v721_v24  ;;  %v1038_v24 = vld [vmem:[%s1834_s4] ss:$0 sm:$0xff] }
 0x5a3   :  { %v727_v28 = vsub.f32 %v717_v10, %v725_v23  ;;  %v1440_v23 = vpack.c.bf16 %v885_v26, %v884_v22 }
 0x5a4   :  { %v726_v29 = vsub.f32 %v716_v12, %v724_v25  ;;  %v877_v12 = vld [vmem:[#allocation10 + $0x38] sm:$0xff] }
 0x5a5   :  { %v729_v30 = vmul.f32 %v1791_v27, %v727_v28  ;;  %v1424_v13 = vpack.c.bf16 %v877_v12, %v876_v11 }
 0x5a6   :  { %v728_v31 = vmul.f32 %v1791_v27, %v726_v29 }
 0x5a7   :  { %v731_v32 = vmul.f32 %v729_v30, %v729_v30  ;;  %1425 = vmatprep.subr.bf16.mxu1 %v1424_v13 }
 0x5a8   :  { %v730_v33 = vmul.f32 %v728_v31, %v728_v31  ;;  %1427 = vmatpush3.bf16.msra.mxu1 %v1424_v13 }
 0x5a9   :  { %734 = vadd.xlane.f32.xlu1 %v731_v32  ;;  %1429 = vmatprep.subr.bf16.mxu1 %v1428_v16 }
 0x5aa   :  { %732 = vadd.xlane.f32.xlu0 %v730_v33 }
 0x5ac   :  { %1431 = vmatpush3.bf16.msra.mxu1 %v1428_v16 }
 0x5ad   :  { %1433 = vmatprep.subr.bf16.mxu1 %v1432_v20 }
 0x5b0   :  { %1435 = vmatpush3.bf16.msra.mxu1 %v1432_v20 }
 0x5b1   :  { %1437 = vmatprep.subr.bf16.mxu1 %v1436_v50 }
 0x5b4   :  { %1439 = vmatpush3.bf16.msra.mxu1 %v1436_v50 }
 0x5b5   :  { %1441 = vmatprep.subr.bf16.mxu1 %v1440_v23 }
 0x5b8   :  { %1443 = vmatpush3.bf16.msra.mxu1 %v1440_v23 }
 0x636   :  { %v735_v58 = vpop.xlane.xlu1 %734 }
 0x637   :  { %v737_v59 = vmul.f32 0.03125, %v735_v58  ;;  %v733_v60 = vpop.xlane.xlu0 %732 }
 0x638   :  { %v736_v61 = vmul.f32 0.03125, %v733_v60 }
 0x639   :  { %v739_v62 = vadd.f32 1e-05, %v737_v59 }
 0x63a   :  { %v738_v63 = vadd.f32 1e-05, %v736_v61 }
 0x63b   :  { %1464 = vrsqrt.f32 %v739_v62 }
 0x63c   :  { %1466 = vrsqrt.f32 %v738_v63 }
 0x645   :  { %v1465_v1 = vpop.eup %1464 }
 0x646   :  { %v1467_v3 = vpop.eup %1466  ;;  %v743_v4 = vmul.f32 %v1465_v1, %v729_v30 }
 0x647   :  { %v742_v5 = vmul.f32 %v1467_v3, %v728_v31 }
 0x648   :  { %v751_v7 = vmul.f32 %v1036_v2, %v743_v4 }
 0x649   :  { %v750_v8 = vmul.f32 %v1036_v2, %v742_v5  ;;  %v1042_v2 = vld [vmem:[%s1839_s9] ss:$0 sm:$0xff] }
 0x64a   :  { %v759_v10 = vadd.f32 %v1037_v6, %v751_v7 }
 0x64b   :  { %v758_v9 = vadd.f32 %v1037_v6, %v750_v8 }
 0x64d   :  { %1246 = vmatprep.mubr.f32.mxu0 %v758_v9 }
 0x64e   :  { %1247 = vmatmul.mubr.f32.vlgmr.msra.gmra.mrb[12].mxu0 %v759_v10 }
 0x721   :  { %v1248_v25 = vpop.f32.mrb[12].mxu0 }
 0x722   :  { %v855_v28 = vadd.f32 %v1248_v25, %v1038_v24  ;;  %v849_v29 = vpop.f32.mrb[13].mxu0 }
 0x723   :  { %v850_v30 = vadd.f32 %v1038_v24, %v849_v29 }
 0x724   :  { %v861_v31 = vmin.f32 %v855_v28, 0.0  ;;  %vm859_vm4 = vcmp.gt.f32.partialorder %v855_v28, 0.0 }
 0x725   :  { %v860_v32 = vmin.f32 %v850_v30, 0.0  ;;  %vm858_vm3 = vcmp.gt.f32.partialorder %v850_v30, 0.0 }
 0x726   :  { %v864_v33 = vmul.f32 1.442695, %v861_v31 }
 0x727   :  { %v862_v34 = vmul.f32 1.442695, %v860_v32 }
 0x728   :  { %1468 = vpow2.f32 %v864_v33 }
 0x729   :  { %1470 = vpow2.f32 %v862_v34 }
 0x732   :  { %v1469_v35 = vpop.eup %1468 }
 0x733   :  { %v1471_v36 = vpop.eup %1470  ;;  %v1040_v37 = vadd.f32 -1.0, %v1469_v35 }
 0x734   :  { %v1039_v38 = vadd.f32 -1.0, %v1471_v36 }
 0x735   :  { %v869_v0 = vsel %vm859_vm4, %v855_v28, %v1040_v37 }
 0x736   :  { %v868_v39 = vsel %vm858_vm3, %v850_v30, %v1039_v38 }
 0x737   :  { %1281 = vmatprep.mubr.f32.mxu1 %v868_v39 }
 0x738   :  { %1282 = vmatmul.mubr.f32.vlgmr.msra.gmra.mrb[4].mxu1 %v869_v0 }
 0x80b   :  { %v1283_v41 = vpop.f32.mrb[4].mxu1 }
 0x80c   :  { %v965_v42 = vadd.f32 %v1283_v41, %v1041_v40  ;;  %v959_v43 = vpop.f32.mrb[5].mxu1 }
 0x80d   :  { %v960_v44 = vadd.f32 %v1041_v40, %v959_v43 }
 0x80e   :  { %v969_v45 = vadd.f32 %v965_v42, %v759_v10 }
 0x80f   :  { %v968_v46 = vadd.f32 %v960_v44, %v758_v9 }
 0x810   :  { %974 = vadd.xlane.f32.xlu1 %v969_v45 }
 0x811   :  { %972 = vadd.xlane.f32.xlu0 %v968_v46 }
 0x89d   :  { %v975_v47 = vpop.xlane.xlu1 %974 }
 0x89e   :  { %v977_v48 = vmul.f32 0.03125, %v975_v47  ;;  %v973_v49 = vpop.xlane.xlu0 %972 }
 0x89f   :  { %v976_v51 = vmul.f32 0.03125, %v973_v49 }
 0x8a0   :  { %v979_v52 = vsub.f32 %v969_v45, %v977_v48 }
 0x8a1   :  { %v978_v53 = vsub.f32 %v968_v46, %v976_v51 }
 0x8a2   :  { %v981_v54 = vmul.f32 %v1791_v27, %v979_v52 }
 0x8a3   :  { %v980_v55 = vmul.f32 %v1791_v27, %v978_v53  ;;  %v1043_v27 = vld [vmem:[%s1840_s10] ss:$0 sm:$0xff] }
 0x8a4   :  { %v983_v56 = vmul.f32 %v981_v54, %v981_v54 }
 0x8a5   :  { %v982_v57 = vmul.f32 %v980_v55, %v980_v55 }
 0x8a6   :  { %986 = vadd.xlane.f32.xlu1 %v983_v56 }
 0x8a7   :  { %984 = vadd.xlane.f32.xlu0 %v982_v57 }
 0x933   :  { %v987_v58 = vpop.xlane.xlu1 %986 }
 0x934   :  { %v989_v59 = vmul.f32 0.03125, %v987_v58  ;;  %v985_v60 = vpop.xlane.xlu0 %984 }
 0x935   :  { %v988_v61 = vmul.f32 0.03125, %v985_v60 }
 0x936   :  { %v991_v62 = vadd.f32 1e-05, %v989_v59 }
 0x937   :  { %v990_v63 = vadd.f32 1e-05, %v988_v61 }
 0x938   :  { %1472 = vrsqrt.f32 %v991_v62 }
 0x939   :  { %1474 = vrsqrt.f32 %v990_v63 }
 0x942   :  { %v1473_v1 = vpop.eup %1472 }
 0x943   :  { %v1475_v3 = vpop.eup %1474  ;;  %v995_v4 = vmul.f32 %v1473_v1, %v981_v54 }
 0x944   :  { %v994_v5 = vmul.f32 %v1475_v3, %v980_v55 }
 0x945   :  { %v1003_v6 = vmul.f32 %v1042_v2, %v995_v4 }
 0x946   :  { %v1002_v7 = vmul.f32 %v1042_v2, %v994_v5 }
 0x947   :  { %v1011_v8 = vadd.f32 %v1043_v27, %v1003_v6 }
 0x948   :  { %v1010_v9 = vadd.f32 %v1043_v27, %v1002_v7 }
 0x949   :  { %1013 = vst [vmem:[#allocation11 + $0x8] sm:$0xff] %v1011_v8 }
 0x94a   :  { %1012 = vst [vmem:[#allocation11] sm:$0xff] %v1010_v9 }
 0x94b   :  { %1597 = shalt.err (!%p1594_p2)
}
 0x94c   :  { %s1598_s10 = scalar_lea.hbm %s1841_s11, 256 }
 0x94d   :  { %p1599_p3 = scmp.ne.s32.totalorder %s1841_s11, %s1598_s10  ;;  %p1602_p4 = scmp.lt.u32.totalorder %s1598_s10, %s1841_s11 }
 0x94f   :  { %p1604_p5 = pnand %p1602_p4, %p1599_p3 }
 0x951   :  { %1607 = shalt.err (!%p1604_p5)
}
 0x952   :  { %1025 = dma.vmem_to_hbm [thread:$0]  %s1020_s0, 256, %s1841_s11, [#allocation4], %s1621_s18, %s1621_s18, %s1622_s24  }
 0x953   :  { %1614 = dma.done.wait [#allocation4], 256  }
 0x954   :  { %1615 = vsyncadd [#allocation4], 4294967040 }
 0x955   :  { %1029 = vsyncpa [#allocation3], 1 }
 0x956   :  { %1030 = vsyncpa [#allocation6], 1 }
 0x957   :  { %1031 = vsyncpa [#allocation9], 1 }
 0x958   :  { %1032 = vsyncpa [#allocation4], 1 }

</bundles_post_ra>
